<compile_context>
chip_gen: v7x
topology: tpu7x:2x2x1
jax: 0.10.0
libtpu: 0.0.40
codegen_flags: <defaults>
</compile_context>

<pallas_src>
import jax
import jax.numpy as jnp
from jax.experimental import pallas as pl
from jax.experimental.pallas import tpu as pltpu


# --------------------------------------------------------------------------
# Kernel
# --------------------------------------------------------------------------
def make_critic_ensemble_kernel(num_hidden_dec_layers: int,
                                inv_num_ensembles: float):
    """Kernel over fused (ensemble-concatenated) parameters.

    Ref layout (in order):
      x_ref  : (Bt, S+A)        concatenated [state | action]
      we_ref : (S+A, H0)        encoder weight (state rows pre-scaled by 1/std)
      be_ref : (1, H0)          encoder bias   (state_avg folded in)
      then for each hidden decoder layer li (ReLU after each):
        w_ref: (d_in, d_out)    layer-0: (H0, E*H1); others: block-diagonal
        b_ref: (1, d_out)
      wl_ref : (1, E*H_last)    final heads, flattened lane-dense
      bl_ref : (1, 1)           mean of final biases over the ensemble
      out_ref: (Bt, 1)
    """

    def kernel(x_ref, we_ref, be_ref, *rest):
        hidden_refs = rest[:2 * num_hidden_dec_layers]
        wl_ref = rest[-3]
        bl_ref = rest[-2]
        out_ref = rest[-1]

        # encoder_sa: one lane-dense matmul (normalisation already folded in)
        h = (jnp.dot(x_ref[...], we_ref[...],
                     preferred_element_type=jnp.float32)
             + be_ref[...])                                   # (Bt, H0)

        # hidden decoder layers, ensemble-fused along the lane axis
        for li in range(num_hidden_dec_layers):
            w = hidden_refs[2 * li][...]
            b = hidden_refs[2 * li + 1][...]
            h = jnp.maximum(
                jnp.dot(h, w, preferred_element_type=jnp.float32) + b, 0.0)

        # final heads + ensemble mean: multiply by the flattened head row,
        # lane-reduce (XLU), scale by 1/E and add the mean final bias.
        out_ref[...] = (jnp.sum(h * wl_ref[...], axis=-1, keepdims=True)
                        * inv_num_ensembles
                        + bl_ref[...])                        # (Bt, 1)

    return kernel


# --------------------------------------------------------------------------
# Wrapper-side one-time parameter re-layout (pure weight transforms)
# --------------------------------------------------------------------------
def prepare_fused_params(params, num_ensembles, num_dec_layers):
    """Fold normalisation into the encoder and concatenate the ensemble
    along the lane dimension.  Returns a flat list of 2D f32 arrays matching
    the kernel's ref order (after x)."""
    inv_std = 1.0 / params["state_std"]                       # (1, S)

    # encoder: stack [state | action] input weights; fold (x-avg)/std in.
    we = jnp.concatenate([params["enc_ws"] * inv_std.T,       # (S, H0) scaled rows
                          params["enc_wa"]], axis=0)          # (S+A, H0)
    be = params["enc_b"] - (params["state_avg"] * inv_std) @ params["enc_ws"]

    fused = [we.astype(jnp.float32), be.astype(jnp.float32)]

    # hidden decoder layers (all but the final (., 1) layer)
    for li in range(num_dec_layers - 1):
        w = params[f"dec_w{li}"]                              # (E, Hin, Hout)
        b = params[f"dec_b{li}"]                              # (E, 1, Hout)
        E, hin, hout = w.shape
        if li == 0:
            # shared input H0 -> concatenate heads along the output (lane) axis
            wc = jnp.transpose(w, (1, 0, 2)).reshape(hin, E * hout)
        else:
            # per-ensemble inputs -> block-diagonal, stays lane-dense & e-major
            wc = jax.scipy.linalg.block_diag(*[w[e] for e in range(E)])
        bc = b.reshape(1, E * hout)
        fused.extend([wc.astype(jnp.float32), bc.astype(jnp.float32)])

    # final layer (Hl -> 1) per ensemble, fused with the ensemble mean
    wl = params[f"dec_w{num_dec_layers - 1}"]                 # (E, Hl, 1)
    bl = params[f"dec_b{num_dec_layers - 1}"]                 # (E, 1, 1)
    fused.append(wl[..., 0].reshape(1, -1).astype(jnp.float32))   # (1, E*Hl)
    fused.append(jnp.mean(bl).reshape(1, 1).astype(jnp.float32))  # (1, 1)
    return fused


# --------------------------------------------------------------------------
# pallas_call wrapper
# --------------------------------------------------------------------------
def critic_ensemble_forward(state, action, fused_params, num_ensembles,
                            num_dec_layers, batch_tile=512):
    x = jnp.concatenate([state, action], axis=1).astype(jnp.float32)
    B, K = x.shape
    num_hidden = num_dec_layers - 1
    kernel = make_critic_ensemble_kernel(num_hidden, 1.0 / num_ensembles)
    args = [x, *fused_params]

    if B < batch_tile or B % batch_tile != 0:
        # Grid-less, fully VMEM-resident: at these shapes the whole problem
        # (~100 KB) fits easily; a grid would only add pipeline overhead.
        vmem = pl.BlockSpec(memory_space=pltpu.MemorySpace.VMEM)
        return pl.pallas_call(
            kernel,
            out_shape=jax.ShapeDtypeStruct((B, 1), jnp.float32),
            in_specs=[vmem] * len(args),
            out_specs=vmem,
        )(*args)

    # Large batch: tile the batch and mark it "parallel" so the work shards
    # across TensorCores (v7x megacore); params are broadcast to every tile.
    in_specs = [pl.BlockSpec((batch_tile, K), lambda i: (i, 0))]
    for p in fused_params:
        in_specs.append(pl.BlockSpec(p.shape, lambda i: (0, 0)))
    return pl.pallas_call(
        kernel,
        out_shape=jax.ShapeDtypeStruct((B, 1), jnp.float32),
        grid=(B // batch_tile,),
        in_specs=in_specs,
        out_specs=pl.BlockSpec((batch_tile, 1), lambda i: (i, 0)),
        compiler_params=pltpu.CompilerParams(
            dimension_semantics=("parallel",)),
    )(*args)


# --------------------------------------------------------------------------
# Pure-JAX reference (mirrors the PyTorch module, unfused params)
# --------------------------------------------------------------------------
def ref_forward(state, action, params, num_ensembles, num_dec_layers):
    s_norm = (state - params["state_avg"]) / params["state_std"]
    enc = s_norm @ params["enc_ws"] + action @ params["enc_wa"] + params["enc_b"]
    qs = []
    for e in range(num_ensembles):
        h = enc
        for li in range(num_dec_layers):
            h = h @ params[f"dec_w{li}"][e] + params[f"dec_b{li}"][e]
            if li < num_dec_layers - 1:
                h = jnp.maximum(h, 0.0)
        qs.append(h)
    values = jnp.concatenate(qs, axis=-1)                     # (B, E)
    return jnp.mean(values, axis=-1, keepdims=True)           # (B, 1)


# --------------------------------------------------------------------------
# Deterministic synthetic parameter init (per-ensemble "PyTorch-style" layout)
# --------------------------------------------------------------------------
def init_params(key, state_dim, action_dim, net_dims, num_ensembles):
    dims = [*net_dims, 1]                                     # decoder_q layer sizes
    num_dec_layers = len(dims) - 1
    keys = jax.random.split(key, 5 + 2 * num_dec_layers)

    params = {
        # non-trivial normalisation stats so the weight-folding is exercised
        "state_avg": 0.2 * jax.random.normal(keys[3], (1, state_dim), jnp.float32),
        "state_std": 0.5 + jnp.abs(jax.random.normal(keys[4], (1, state_dim),
                                                     jnp.float32)),
        # encoder_sa: Linear(state_dim + action_dim, net_dims[0]) split by input
        "enc_ws": 0.1 * jax.random.normal(keys[0], (state_dim, net_dims[0]),
                                          jnp.float32),
        "enc_wa": 0.1 * jax.random.normal(keys[1], (action_dim, net_dims[0]),
                                          jnp.float32),
        "enc_b": 0.01 * jax.random.normal(keys[2], (1, net_dims[0]), jnp.float32),
    }
    for li in range(num_dec_layers):
        d_in, d_out = dims[li], dims[li + 1]
        w = 0.1 * jax.random.normal(keys[5 + 2 * li],
                                    (num_ensembles, d_in, d_out), jnp.float32)
        if li == num_dec_layers - 1:
            # final layer: PyTorch uses orthogonal(std=0.5), bias=1e-6
            w = 0.5 * w
            b = jnp.full((num_ensembles, 1, d_out), 1e-6, jnp.float32)
        else:
            b = 0.01 * jax.random.normal(keys[6 + 2 * li],
                                         (num_ensembles, 1, d_out), jnp.float32)
        params[f"dec_w{li}"] = w
        params[f"dec_b{li}"] = b
    return params, num_dec_layers


if __name__ == "__main__":
    # Small, module-consistent shapes.
    batch = 8
    state_dim = 16
    action_dim = 8
    net_dims = [64, 32]
    num_ensembles = 8

    key = jax.random.PRNGKey(0)
    k_state, k_action, k_params, k_s2, k_a2 = jax.random.split(key, 5)

    state = jax.random.normal(k_state, (batch, state_dim), jnp.float32)
    action = jax.random.normal(k_action, (batch, action_dim), jnp.float32)
    params, num_dec_layers = init_params(k_params, state_dim, action_dim,
                                         net_dims, num_ensembles)
    fused_params = prepare_fused_params(params, num_ensembles, num_dec_layers)

    # --- small batch: grid-less path ---------------------------------------
    out = critic_ensemble_forward(state, action, fused_params,
                                  num_ensembles, num_dec_layers)
    out = jax.block_until_ready(out)
    ref = ref_forward(state, action, params, num_ensembles, num_dec_layers)
    assert out.shape == (batch, 1)
    assert jnp.allclose(out, ref, atol=1e-4, rtol=1e-4), (out, ref)

    # --- large batch: tiled "parallel" grid path ---------------------------
    big_batch = 512
    state_b = jax.random.normal(k_s2, (big_batch, state_dim), jnp.float32)
    action_b = jax.random.normal(k_a2, (big_batch, action_dim), jnp.float32)
    out_b = critic_ensemble_forward(state_b, action_b, fused_params,
                                    num_ensembles, num_dec_layers,
                                    batch_tile=256)
    out_b = jax.block_until_ready(out_b)
    ref_b = ref_forward(state_b, action_b, params, num_ensembles, num_dec_layers)
    assert out_b.shape == (big_batch, 1)
    assert jnp.allclose(out_b, ref_b, atol=1e-4, rtol=1e-4)

    print("KERNEL_OK")
</pallas_src>

<mosaic_0001>
module attributes {stable_mosaic.version = 11 : i64} {
  func.func @kernel(%arg0: memref<8x24xf32, #tpu.memory_space<vmem>>, %arg1: memref<24x64xf32, #tpu.memory_space<vmem>>, %arg2: memref<1x64xf32, #tpu.memory_space<vmem>>, %arg3: memref<64x256xf32, #tpu.memory_space<vmem>>, %arg4: memref<1x256xf32, #tpu.memory_space<vmem>>, %arg5: memref<1x256xf32, #tpu.memory_space<vmem>>, %arg6: memref<1x1xf32, #tpu.memory_space<vmem>>, %arg7: memref<8x1xf32, #tpu.memory_space<vmem>>) attributes {dimension_semantics = [], scalar_prefetch = 0 : i64, scratch_operands = 0 : i64, tpu.core_type = #tpu.core_type<tc>} {
    %c0 = arith.constant 0 : index
    %c0_0 = arith.constant 0 : index
    %0 = vector.load %arg0[%c0, %c0_0] : memref<8x24xf32, #tpu.memory_space<vmem>>, vector<8x24xf32>
    %c0_1 = arith.constant 0 : index
    %c0_2 = arith.constant 0 : index
    %1 = vector.load %arg1[%c0_1, %c0_2] : memref<24x64xf32, #tpu.memory_space<vmem>>, vector<24x64xf32>
    %cst = arith.constant dense<0.000000e+00> : vector<8x64xf32>
    %2 = tpu.matmul %0, %1, %cst {dimension_numbers = #tpu.dot_dimension_numbers<[1], [0], [0], [1], [0, 0, 1, 1], [], []>} : vector<8x24xf32>, vector<24x64xf32>, vector<8x64xf32> -> vector<8x64xf32>
    %c0_3 = arith.constant 0 : index
    %c0_4 = arith.constant 0 : index
    %3 = vector.load %arg2[%c0_3, %c0_4] : memref<1x64xf32, #tpu.memory_space<vmem>>, vector<1x64xf32>
    %4 = vector.broadcast %3 : vector<1x64xf32> to vector<8x64xf32>
    %5 = arith.addf %2, %4 : vector<8x64xf32>
    %c0_5 = arith.constant 0 : index
    %c0_6 = arith.constant 0 : index
    %6 = vector.load %arg3[%c0_5, %c0_6] : memref<64x256xf32, #tpu.memory_space<vmem>>, vector<64x256xf32>
    %c0_7 = arith.constant 0 : index
    %c0_8 = arith.constant 0 : index
    %7 = vector.load %arg4[%c0_7, %c0_8] : memref<1x256xf32, #tpu.memory_space<vmem>>, vector<1x256xf32>
    %cst_9 = arith.constant dense<0.000000e+00> : vector<8x256xf32>
    %8 = tpu.matmul %5, %6, %cst_9 {dimension_numbers = #tpu.dot_dimension_numbers<[1], [0], [0], [1], [0, 0, 1, 1], [], []>} : vector<8x64xf32>, vector<64x256xf32>, vector<8x256xf32> -> vector<8x256xf32>
    %9 = vector.broadcast %7 : vector<1x256xf32> to vector<8x256xf32>
    %10 = arith.addf %8, %9 : vector<8x256xf32>
    %cst_10 = arith.constant 0.000000e+00 : f32
    %11 = vector.broadcast %cst_10 : f32 to vector<8x256xf32>
    %12 = arith.maximumf %10, %11 : vector<8x256xf32>
    %c0_11 = arith.constant 0 : index
    %c0_12 = arith.constant 0 : index
    %13 = vector.load %arg5[%c0_11, %c0_12] : memref<1x256xf32, #tpu.memory_space<vmem>>, vector<1x256xf32>
    %14 = vector.broadcast %13 : vector<1x256xf32> to vector<8x256xf32>
    %15 = arith.mulf %12, %14 : vector<8x256xf32>
    %cst_13 = arith.constant dense<0.000000e+00> : vector<8xf32>
    %16 = vector.multi_reduction <add>, %15, %cst_13 [1] : vector<8x256xf32> to vector<8xf32>
    %17 = vector.shape_cast %16 : vector<8xf32> to vector<8x1xf32>
    %cst_14 = arith.constant 1.250000e-01 : f32
    %18 = vector.broadcast %cst_14 : f32 to vector<8x1xf32>
    %19 = arith.mulf %17, %18 : vector<8x1xf32>
    %c0_15 = arith.constant 0 : index
    %c0_16 = arith.constant 0 : index
    %20 = vector.load %arg6[%c0_15, %c0_16] : memref<1x1xf32, #tpu.memory_space<vmem>>, vector<1x1xf32>
    %21 = vector.broadcast %20 : vector<1x1xf32> to vector<8x1xf32>
    %22 = arith.addf %19, %21 : vector<8x1xf32>
    %c0_17 = arith.constant 0 : index
    %c0_18 = arith.constant 0 : index
    %23 = vector.load %arg7[%c0_17, %c0_18] : memref<8x1xf32, #tpu.memory_space<vmem>>, vector<8x1xf32>
    tpu.vector_store %arg7[%c0_17, %c0_18], %22 {strides = array<i32>} : memref<8x1xf32, #tpu.memory_space<vmem>>, vector<8x1xf32>,
    return
  }
}

</mosaic_0001>

<bundles_post_ra>
// kernel: tpu_custom_call.1
= control target key start
LH: loop header
LB: loop body
LE: loop exit
PB: predicated region body
PF: predicated region fallthrough
CT: control target
= control target key end

     0   :  { %s508_s0 = inlined_call_operand.hbm [shape: f32[8,24], index: 0, kind: input, shape index: {}]   ;;  %s509_s1 = inlined_call_operand.hbm [shape: f32[24,64], index: 1, kind: input, shape index: {}]   ;;  %s510_s2 = inlined_call_operand.vmem [shape: f32[1,64], index: 2, kind: input, shape index: {}]   ;;  %s511_s3 = inlined_call_operand.hbm [shape: f32[64,256], index: 3, kind: input, shape index: {}]   ;;  %s512_s4 = inlined_call_operand.vmem [shape: f32[1,256], index: 4, kind: input, shape index: {}]   ;;  %s513_s5 = inlined_call_operand.vmem [shape: f32[1,256], index: 5, kind: input, shape index: {}]   ;;  %s514_s6 = inlined_call_operand.<no memory space> [shape: f32[1,1], index: 6, kind: input, shape index: {}]   ;;  %s515_s7 = inlined_call_operand.vmem [shape: f32[8,1], index: 7, kind: output, shape index: {}]  }
   0x1   :  { %v12_v0 = vstv %s514_s6 }
   0x2   :  { %13 = vst [vmem:[#allocation2] sm:$0x1] %v12_v0 }
   0x3   :  { %14 = vsyncpa [#allocation4], 0 }
   0x4   :  { %15 = vsyncpa [#allocation6], 0  ;;  %s407_s26 = smov [#allocation5]   ;;  %s337_s30 = scalar_lea.hbm %s509_s1, 384 }
   0x5   :  { %s31_s27 = sshll.u32 %s407_s26, 4  ;;  %p338_p0 = scmp.ne.s32.totalorder %s509_s1, %s337_s30  ;;  %s32_s27 = int_to_ptr.vmem [resolvable:$true] %s31_s27 }
   0x6   :  { %p341_p1 = scmp.lt.u32.totalorder %s337_s30, %s509_s1 }
   0x8   :  { %p343_p2 = pnand %p341_p1, %p338_p0 }
   0xa   :  { %346 = shalt.err (!%p343_p2)
}
   0xb   :  { %s347_s6 = scalar_lea.vmem %s32_s27, 384  ;;  %p352_p4 = scmp.lt.s32.totalorder %s32_s27, %s32_s27 }
   0xc   :  { %p348_p3 = scmp.ne.s32.totalorder %s32_s27, %s347_s6  ;;  %p353_p5 = scmp.lt.s32.totalorder %s347_s6, %s347_s6 }
   0xe   :  { %p354_p6 = por %p353_p5, %p352_p4 }
  0x10   :  { %p355_p7 = pnand %p354_p6, %p348_p3 }
  0x12   :  { %358 = shalt.err (!%p355_p7)
}
  0x13   :  { %s408_s12 = smov 128   ;;  %s409_s13 = smov 8  }
  0x14   :  { %37 = dma.hbm_to_vmem [thread:$0]  %s509_s1, 384, %s32_s27, [#allocation6], %s408_s12, %s408_s12, %s409_s13  }
  0x15   :  { %s410_s16 = smov [#allocation3]   ;;  %s411_s18 = smov [#allocation7]  }
  0x16   :  { %s22_s17 = sshll.u32 %s410_s16, 4  ;;  %s45_s19 = sshll.u32 %s411_s18, 4  ;;  %s23_s17 = int_to_ptr.vmem [resolvable:$true] %s22_s17  ;;  %s46_s19 = int_to_ptr.vmem [resolvable:$true] %s45_s19 }
  0x17   :  { %s359_s22 = scalar_lea.hbm %s508_s0, 128 }
  0x18   :  { %p360_p8 = scmp.ne.s32.totalorder %s508_s0, %s359_s22  ;;  %p363_p9 = scmp.lt.u32.totalorder %s359_s22, %s508_s0 }
  0x1a   :  { %p365_p10 = pnand %p363_p9, %p360_p8 }
  0x1c   :  { %368 = shalt.err (!%p365_p10)
}
  0x1d   :  { %s369_s1 = scalar_lea.vmem %s23_s17, 128  ;;  %p374_p12 = scmp.lt.s32.totalorder %s23_s17, %s23_s17 }
  0x1e   :  { %p370_p11 = scmp.ne.s32.totalorder %s23_s17, %s369_s1  ;;  %p375_p13 = scmp.lt.s32.totalorder %s369_s1, %s369_s1 }
  0x20   :  { %p376_p0 = por %p375_p13, %p374_p12 }
  0x22   :  { %p377_p1 = pnand %p376_p0, %p370_p11 }
  0x24   :  { %380 = shalt.err (!%p377_p1)
}
  0x25   :  { %25 = dma.hbm_to_vmem [thread:$0]  %s508_s0, 128, %s23_s17, [#allocation4]  }
  0x26   :  { %s381_s8 = scalar_lea.hbm %s511_s3, 2048 }
  0x27   :  { %p382_p2 = scmp.ne.s32.totalorder %s511_s3, %s381_s8  ;;  %p385_p3 = scmp.lt.u32.totalorder %s381_s8, %s511_s3 }
  0x29   :  { %p387_p4 = pnand %p385_p3, %p382_p2 }
  0x2b   :  { %390 = shalt.err (!%p387_p4)
}
  0x2c   :  { %s391_s12 = scalar_lea.vmem %s46_s19, 2048  ;;  %p396_p6 = scmp.lt.s32.totalorder %s46_s19, %s46_s19 }
  0x2d   :  { %p392_p5 = scmp.ne.s32.totalorder %s46_s19, %s391_s12  ;;  %p397_p7 = scmp.lt.s32.totalorder %s391_s12, %s391_s12 }
  0x2f   :  { %p398_p8 = por %p397_p7, %p396_p6 }
  0x31   :  { %p399_p9 = pnand %p398_p8, %p392_p5 }
  0x33   :  { %402 = shalt.err (!%p399_p9)
}
  0x34   :  { %s412_s0 = smov 256   ;;  %s413_s13 = smov 16  }
  0x35   :  { %51 = dma.hbm_to_vmem [thread:$0]  %s511_s3, 2048, %s46_s19, [#allocation6], %s412_s0, %s412_s0, %s413_s13  }
  0x36   :  { %403 = dma.done.wait [#allocation4], 128  }
  0x37   :  { %404 = vsyncadd [#allocation4], 4294967168 }
  0x38   :  { %405 = dma.done.wait [#allocation6], 2432  }
  0x39   :  { %406 = vsyncadd [#allocation6], 4294964864  ;;  %v414_v1 = vmov 0.0|0.0   ;;  %vm415_vm0 = vmmov 0   ;;  %v416_v2 = vmov 0.0   ;;  %v68_v3 = vld [vmem:[#allocation5] sm:$0xff]  ;;  %v170_v36 = vlaneseq }
  0x3a   :  { %308 = vmatprep.subr.bf16.mxu0 %v414_v1  ;;  %305 = vmatprep.mubr.msk.f32.mxu0 %vm415_vm0, %v416_v2  ;;  %v69_v4 = vld [vmem:[#allocation5 + $0x8] sm:$0xff]  ;;  %v153_v6 = vld [vmem:[#allocation7 + $0x8] sm:$0xff]  ;;  %v155_v7 = vld [vmem:[#allocation7 + $0x18] sm:$0xff]  ;;  %vm78_vm1 = vcmask 195584   ;;  %vm180_vm2 = vcmask 523264   ;;  %vm283_vm3 = vcmask 7168  }
  0x3b   :  { %248 = vmatprep.mubr.f32.mxu1 %v416_v2  ;;  %v309_v5 = vpack.c.bf16 %v69_v4, %v68_v3  ;;  %v311_v8 = vpack.c.bf16 %v155_v7, %v153_v6  ;;  %v152_v9 = vld [vmem:[#allocation7] sm:$0xff]  ;;  %v154_v10 = vld [vmem:[#allocation7 + $0x10] sm:$0xff]  ;;  %v157_v11 = vld [vmem:[#allocation7 + $0x28] sm:$0xff]  ;;  %v171_v37 = vshrl.u32 %v170_v36, 7 }
  0x3c   :  { %v313_v12 = vpack.c.bf16 %v154_v10, %v152_v9  ;;  %v159_v13 = vld [vmem:[#allocation7 + $0x38] sm:$0xff]  ;;  %v156_v14 = vld [vmem:[#allocation7 + $0x20] sm:$0xff]  ;;  %v158_v15 = vld [vmem:[#allocation7 + $0x30] sm:$0xff] }
  0x3d   :  { %310 = vmatpush3.bf16.msra.mxu0 %v309_v5  ;;  %v70_v16 = vld [vmem:[#allocation5 + $0x10] sm:$0xff]  ;;  %312 = vmatprep.subr.bf16.mxu1 %v311_v8  ;;  %v315_v17 = vpack.c.bf16 %v159_v13, %v157_v11  ;;  %v161_v18 = vld [vmem:[#allocation7 + $0x48] sm:$0xff]  ;;  %v67_v20 = vld [vmem:[#allocation3] sm:$0xff]  ;;  %v317_v21 = vpack.c.bf16 %v158_v15, %v156_v14  ;;  %v172_v38 = vsub.s32 0, %v171_v37  ;;  %v176_v40 = vsub.s32 1, %v171_v37 }
  0x3e   :  { %303 = vmatprep.subr.mxu0 %v416_v2  ;;  %v163_v19 = vld [vmem:[#allocation7 + $0x58] sm:$0xff]  ;;  %314 = vmatpush1.bf16.msra.mxu1 %v313_v12  ;;  %v160_v23 = vld [vmem:[#allocation7 + $0x40] sm:$0xff]  ;;  %v162_v24 = vld [vmem:[#allocation7 + $0x50] sm:$0xff] }
  0x3f   :  { %316 = vmatprep.subr.bf16.mxu1 %v315_v17  ;;  %v319_v22 = vpack.c.bf16 %v163_v19, %v161_v18  ;;  %v165_v25 = vld [vmem:[#allocation7 + $0x68] sm:$0xff]  ;;  %v167_v26 = vld [vmem:[#allocation7 + $0x78] sm:$0xff]  ;;  %v321_v27 = vpack.c.bf16 %v162_v24, %v160_v23  ;;  %v164_v29 = vld [vmem:[#allocation7 + $0x60] sm:$0xff] }
  0x40   :  { %v323_v28 = vpack.c.bf16 %v167_v26, %v165_v25  ;;  %v166_v30 = vld [vmem:[#allocation7 + $0x70] sm:$0xff]  ;;  %v291_v32 = vld [vmem:[%s510_s2] ss:$0 sm:$0xff] }
  0x41   :  { %304 = vmatpush3.msra.mxu0 %v70_v16  ;;  %v325_v31 = vpack.c.bf16 %v166_v30, %v164_v29  ;;  %v168_v39 = vld [vmem:[%s512_s4] sm:$0x3] }
  0x42   :  { %306 = vmatmul.mubr.msk.f32.vlgmr.msra.gmra.mrb[0].mxu0 %vm78_vm1, %v67_v20  ;;  %318 = vmatpush1.bf16.msra.mxu1 %v317_v21  ;;  %v173_v41 = vrot.slane %v168_v39, %v172_v38  ;;  %v177_v42 = vrot.slane %v168_v39, %v176_v40  ;;  %v257_v43 = vld [vmem:[%s513_s5] sm:$0x3] }
  0x43   :  { %320 = vmatprep.subr.bf16.mxu1 %v319_v22  ;;  %v262_v47 = vrot.slane %v257_v43, %v172_v38  ;;  %v266_v49 = vrot.slane %v257_v43, %v176_v40  ;;  %v294_v56 = vld [vmem:[#allocation2] ss:$0 sm:$0xff] }
  0x46   :  { %322 = vmatpush1.bf16.msra.mxu1 %v321_v27 }
  0x47   :  { %324 = vmatprep.subr.bf16.mxu1 %v323_v28 }
  0x4a   :  { %326 = vmatpush1.bf16.msra.mxu1 %v325_v31 }
 0x115   :  { %v148_v33 = vpop.f32.mrb[0].mxu0 }
 0x116   :  { %v149_v34 = vadd.f32 %v291_v32, %v148_v33  ;;  %v307_v35 = vpop.f32.mrb[1].mxu0 }
 0x118   :  { %293 = vmatmul.mubr.msk.f32.vlgmr.msra.gmra.mrb[0].mxu1 %vm180_vm2, %v149_v34 }
 0x1eb   :  { %v250_v44 = vpop.f32.mrb[0].mxu1 }
 0x1ec   :  { %v251_v45 = vadd.f32 %v250_v44, %v173_v41  ;;  %v252_v46 = vpop.f32.mrb[1].mxu1 }
 0x1ed   :  { %v253_v48 = vadd.f32 %v252_v46, %v177_v42 }
 0x1ee   :  { %v255_v50 = vmax.f32 %v251_v45, 0.0 }
 0x1ef   :  { %v256_v51 = vmax.f32 %v253_v48, 0.0 }
 0x1f0   :  { %v269_v52 = vmul.f32 %v262_v47, %v255_v50 }
 0x1f1   :  { %v270_v53 = vmul.f32 %v266_v49, %v256_v51 }
 0x1f3   :  { %v271_v54 = vadd.f32 %v270_v53, %v269_v52 }
 0x1f5   :  { %272 = vadd.xlane.f32.xlu0 %v271_v54 }
 0x282   :  { %v273_v55 = vpop.xlane.xlu0 %272 }
 0x283   :  { %v274_v57 = vmul.f32 0.125, %v273_v55 }
 0x285   :  { %v282_v58 = vadd.f32 %v294_v56, %v274_v57 }
 0x287   :  { %284 = vst.msk [vmem:[%s515_s7] sm:$0xff] %vm283_vm3, %v282_v58 }
 0x288   :  { %289 = vsyncpa [#allocation4], 1 }
 0x289   :  { %290 = vsyncpa [#allocation6], 1 }

</bundles_post_ra>
